<compile_context>
chip_gen: v6e
topology: v6e:2x2x1
jax: 0.10.0
libtpu: 0.0.40
codegen_flags: <defaults>
</compile_context>

<pallas_src>
import functools

import jax
import jax.numpy as jnp
from jax.experimental import pallas as pl
from jax.experimental.pallas import tpu as pltpu


def _mlp_kernel(x_ref, w1_ref, b1_ref, w2_ref, b2_ref, w3_ref, b3_ref, o_ref):
    # x tile: (blk, input_dim) in the compute dtype (bf16 by default).
    # Weights arrive pre-transposed (in, out), so every layer is a plain A @ B:
    # no transposes of the big activation tile, batch-major throughout, and the
    # (blk, 16) output block is stored directly (output traffic is tiny, so the
    # 16-lane store is negligible next to the x read).
    cdt = w1_ref.dtype
    h = jnp.dot(x_ref[...], w1_ref[...], preferred_element_type=jnp.float32)
    h = jnp.maximum(h + b1_ref[...], 0.0)                       # (blk, 64) f32
    h = jnp.dot(h.astype(cdt), w2_ref[...], preferred_element_type=jnp.float32)
    h = jnp.maximum(h + b2_ref[...], 0.0)                       # (blk, 32) f32
    h = jnp.dot(h.astype(cdt), w3_ref[...], preferred_element_type=jnp.float32)
    h = jnp.maximum(h + b3_ref[...], 0.0)                       # (blk, 16) f32
    o_ref[...] = h.astype(o_ref.dtype)


def _round_up(n, m):
    return ((n + m - 1) // m) * m


def _tpu_hw():
    """Best-effort (VMEM capacity per core, TensorCores per chip)."""
    vmem_cap = 64 << 20          # v7x is the smallest per-TC VMEM -> safe default
    num_cores = 1                # single-TC default (v5e/v6e behaviour)
    try:
        info = pltpu.get_tpu_info()
        vmem_cap = int(getattr(info, "vmem_capacity_bytes", vmem_cap) or vmem_cap)
        for name in ("num_cores", "num_tensorcores", "tensorcores_per_chip",
                     "core_count"):
            v = getattr(info, name, None)
            if v:
                num_cores = int(v)
                break
    except Exception:
        pass
    if num_cores == 1:
        try:  # fall back to the device-kind string for 2-TC chips (v7x)
            if "v7" in jax.devices()[0].device_kind.lower():
                num_cores = 2
        except Exception:
            pass
    return vmem_cap, num_cores


def _choose_block_b(B, input_dim, requested, x_itemsize, out_itemsize,
                    vmem_cap, num_cores):
    """Pick the batch-tile size against this generation's VMEM budget.

    Streamed buffers get ~55% of per-core VMEM; the rest covers the resident
    parameters, f32 intermediates and Mosaic internal scratch. The x tile's
    last dim is lane-padded to a multiple of 128 in VMEM, so budget for that.
    """
    lanes_in = _round_up(input_dim, 128)
    per_row = (2 * lanes_in * x_itemsize        # x tile, double-buffered
               + 2 * 128 * out_itemsize         # out tile, double-buffered (lane-padded)
               + 3 * 128 * 4)                   # f32 h1/h2/h3 intermediates
    budget = int(vmem_cap * 0.55)
    cap_rows = max(128, (budget // per_row) // 128 * 128)
    blk = max(128, (min(requested, cap_rows) // 128) * 128)

    B8 = _round_up(B, 8)
    if B8 <= blk:
        if num_cores >= 2 and B8 >= 256:
            # Multi-TensorCore chip (v7x): num_cores roughly-equal 128-aligned
            # tiles so the "parallel" grid axis keeps every core busy.
            blk = _round_up(pl.cdiv(B8, num_cores), 128)
        else:
            # Single-TC chip (v5e/v6e) or tiny batch: one tile; extra grid
            # steps would be pure per-step (~0.35 us) overhead.
            blk = B8
    return blk


@functools.partial(
    jax.jit, static_argnames=("block_b", "compute_dtype", "single_buffer_params"))
def _forward(x, w1, b1, w2, b2, w3, b3, *, block_b, compute_dtype,
             single_buffer_params):
    B, input_dim = x.shape
    out_dtype = x.dtype
    cdt = jnp.dtype(compute_dtype)
    out_itemsize = jnp.dtype(out_dtype).itemsize

    vmem_cap, num_cores = _tpu_hw()
    blk = _choose_block_b(B, input_dim, block_b, cdt.itemsize, out_itemsize,
                          vmem_cap, num_cores)
    grid = (pl.cdiv(B, blk),)   # no jnp.pad: ragged trailing block is masked

    # bf16 inputs/weights halve the dominant HBM read (and fuse upstream when
    # x is produced inside a larger jit); biases & accumulation stay f32.
    xc = x.astype(cdt)
    w1t = w1.T.astype(cdt)                     # (input_dim, 64)
    w2t = w2.T.astype(cdt)                     # (64, 32)
    w3t = w3.T.astype(cdt)                     # (32, 16)
    b1r = b1.reshape(1, -1).astype(jnp.float32)
    b2r = b2.reshape(1, -1).astype(jnp.float32)
    b3r = b3.reshape(1, -1).astype(jnp.float32)

    # Resident parameter blocks (constant index_map). Single-buffered when the
    # running jax supports it (no useless second VMEM copy).
    if single_buffer_params:
        full = lambda a: pl.BlockSpec(a.shape, lambda i: (0,) * a.ndim,
                                      pipeline_mode=pl.Buffered(1))
    else:
        full = lambda a: pl.BlockSpec(a.shape, lambda i: (0,) * a.ndim)

    # Generation-aware VMEM limit (lane/sublane padding included).
    lanes_in = _round_up(input_dim, 128)
    param_bufs = 1 if single_buffer_params else 2
    param_vmem = param_bufs * (
        (_round_up(input_dim, 8) * 128 + 64 * 128 + 32 * 128) * cdt.itemsize
        + 3 * 8 * 128 * 4)
    stream_vmem = (2 * blk * lanes_in * cdt.itemsize
                   + 2 * blk * 128 * out_itemsize
                   + 3 * blk * 128 * 4)
    vmem_limit = int(min(max(stream_vmem + param_vmem + (4 << 20), 32 << 20),
                         int(0.8 * vmem_cap)))

    flops = 2 * B * (input_dim * 64 + 64 * 32 + 32 * 16)
    bytes_accessed = int(B * input_dim * cdt.itemsize
                         + B * 16 * out_itemsize
                         + (input_dim * 64 + 64 * 32 + 32 * 16) * cdt.itemsize
                         + (64 + 32 + 16) * 4)

    # TODO(synk): pipeline_mode=pl.Buffered(3) on the x BlockSpec is a further
    # knob if xprof shows exposed DMA gaps at grid-step boundaries.
    return pl.pallas_call(
        _mlp_kernel,
        out_shape=jax.ShapeDtypeStruct((B, 16), out_dtype),
        grid_spec=pltpu.PrefetchScalarGridSpec(
            num_scalar_prefetch=0,
            grid=grid,
            in_specs=[
                pl.BlockSpec((blk, input_dim), lambda i: (i, 0)),   # x tile
                full(w1t), full(b1r),
                full(w2t), full(b2r),
                full(w3t), full(b3r),
            ],
            out_specs=pl.BlockSpec((blk, 16), lambda i: (i, 0)),
        ),
        compiler_params=pltpu.CompilerParams(
            dimension_semantics=("parallel",),
            vmem_limit_bytes=vmem_limit,
        ),
        cost_estimate=pl.CostEstimate(
            flops=flops, transcendentals=0, bytes_accessed=bytes_accessed),
    )(xc, w1t, b1r, w2t, b2r, w3t, b3r)


_SINGLE_BUFFER_PARAMS_OK = True


def feature_extractor(x, w1, b1, w2, b2, w3, b3, *, block_b=1024,
                      compute_dtype=jnp.bfloat16):
    """Fused 3-layer MLP forward (PyTorch FeatureExtractor semantics).

    x:  (B, input_dim); w1: (64, input_dim), b1: (64,); w2: (32, 64), b2: (32,);
    w3: (16, 32), b3: (16,)  -- PyTorch nn.Linear layout. Returns (B, 16) in
    x.dtype. compute_dtype=jnp.float32 gives an exact f32 path.
    """
    global _SINGLE_BUFFER_PARAMS_OK
    if _SINGLE_BUFFER_PARAMS_OK:
        try:
            return _forward(x, w1, b1, w2, b2, w3, b3, block_b=block_b,
                            compute_dtype=compute_dtype,
                            single_buffer_params=True)
        except Exception:
            # Some jax versions reject single-buffered (Buffered(1)) blocks;
            # fall back to default double-buffered parameter blocks.
            _SINGLE_BUFFER_PARAMS_OK = False
    return _forward(x, w1, b1, w2, b2, w3, b3, block_b=block_b,
                    compute_dtype=compute_dtype, single_buffer_params=False)


def init_params(key, input_dim):
    """PyTorch nn.Linear-style init: U(+/- 1/sqrt(fan_in)), (out, in)/(out,)."""
    dims = [(input_dim, 64), (64, 32), (32, 16)]
    params = []
    for fan_in, fan_out in dims:
        key, kw, kb = jax.random.split(key, 3)
        bound = 1.0 / (fan_in ** 0.5)
        w = jax.random.uniform(kw, (fan_out, fan_in), jnp.float32, -bound, bound)
        b = jax.random.uniform(kb, (fan_out,), jnp.float32, -bound, bound)
        params.extend([w, b])
    return params


def _reference(x, w1, b1, w2, b2, w3, b3):
    h = jax.nn.relu(x @ w1.T + b1)
    h = jax.nn.relu(h @ w2.T + b2)
    h = jax.nn.relu(h @ w3.T + b3)
    return h


if __name__ == "__main__":
    key = jax.random.PRNGKey(0)
    key, kx1, kx2, kx3 = jax.random.split(key, 4)

    input_dim = 32
    params = init_params(key, input_dim)

    # 1) Small batch, single tiny tile. f32 path must match exactly; default
    #    bf16 path must match to bf16 precision.
    x = jax.random.normal(kx1, (8, input_dim), jnp.float32)
    ref = _reference(x, *params)
    out_f32 = jax.block_until_ready(
        feature_extractor(x, *params, compute_dtype=jnp.float32))
    assert out_f32.shape == (8, 16)
    assert jnp.allclose(out_f32, ref, atol=2e-5, rtol=2e-5), "f32 mismatch (B=8)"
    out_bf16 = jax.block_until_ready(feature_extractor(x, *params))
    assert out_bf16.shape == (8, 16)
    assert jnp.allclose(out_bf16, ref, atol=1e-1, rtol=5e-2), "bf16 mismatch (B=8)"

    # 2) Batch not a multiple of 8/128: exercises the masked ragged block
    #    (no wrapper padding).
    x2 = jax.random.normal(kx2, (20, input_dim), jnp.float32)
    ref2 = _reference(x2, *params)
    out2_f32 = jax.block_until_ready(
        feature_extractor(x2, *params, compute_dtype=jnp.float32))
    assert out2_f32.shape == (20, 16)
    assert jnp.allclose(out2_f32, ref2, atol=2e-5, rtol=2e-5), "f32 mismatch (B=20)"
    out2 = jax.block_until_ready(feature_extractor(x2, *params))
    assert jnp.allclose(out2, ref2, atol=1e-1, rtol=5e-2), "bf16 mismatch (B=20)"

    # 3) Multi-tile grid with a ragged last block (forced small tile).
    x3 = jax.random.normal(kx3, (300, input_dim), jnp.float32)
    ref3 = _reference(x3, *params)
    out3_f32 = jax.block_until_ready(
        feature_extractor(x3, *params, block_b=128, compute_dtype=jnp.float32))
    assert out3_f32.shape == (300, 16)
    assert jnp.allclose(out3_f32, ref3, atol=2e-5, rtol=2e-5), "f32 mismatch (B=300)"
    out3 = jax.block_until_ready(feature_extractor(x3, *params, block_b=128))
    assert jnp.allclose(out3, ref3, atol=1e-1, rtol=5e-2), "bf16 mismatch (B=300)"

    print("KERNEL_OK")
</pallas_src>

<mosaic_0001>
module attributes {stable_mosaic.version = 11 : i64} {
  func.func @_mlp_kernel(%arg0: i32, %arg1: memref<8x32xf32, #tpu.memory_space<vmem>>, %arg2: memref<32x64xf32, #tpu.memory_space<vmem>>, %arg3: memref<1x64xf32, #tpu.memory_space<vmem>>, %arg4: memref<64x32xf32, #tpu.memory_space<vmem>>, %arg5: memref<1x32xf32, #tpu.memory_space<vmem>>, %arg6: memref<32x16xf32, #tpu.memory_space<vmem>>, %arg7: memref<1x16xf32, #tpu.memory_space<vmem>>, %arg8: memref<8x16xf32, #tpu.memory_space<vmem>>) attributes {dimension_semantics = [#tpu.dimension_semantics<parallel>], iteration_bounds = array<i64: 1>, scalar_prefetch = 0 : i64, scratch_operands = 0 : i64, tpu.core_type = #tpu.core_type<tc>, window_params = [{transform_indices = @transform_0, window_bounds = array<i64: 8, 32>}, {pipeline_mode = #tpu.pipeline_mode<synchronous>, transform_indices = @transform_1, window_bounds = array<i64: 32, 64>}, {pipeline_mode = #tpu.pipeline_mode<synchronous>, transform_indices = @transform_2, window_bounds = array<i64: 1, 64>}, {pipeline_mode = #tpu.pipeline_mode<synchronous>, transform_indices = @transform_3, window_bounds = array<i64: 64, 32>}, {pipeline_mode = #tpu.pipeline_mode<synchronous>, transform_indices = @transform_4, window_bounds = array<i64: 1, 32>}, {pipeline_mode = #tpu.pipeline_mode<synchronous>, transform_indices = @transform_5, window_bounds = array<i64: 32, 16>}, {pipeline_mode = #tpu.pipeline_mode<synchronous>, transform_indices = @transform_6, window_bounds = array<i64: 1, 16>}, {transform_indices = @transform_7, window_bounds = array<i64: 8, 16>}]} {
    %c0 = arith.constant 0 : index
    %c0_0 = arith.constant 0 : index
    %0 = vector.load %arg1[%c0, %c0_0] : memref<8x32xf32, #tpu.memory_space<vmem>>, vector<8x32xf32>
    %c0_1 = arith.constant 0 : index
    %c0_2 = arith.constant 0 : index
    %1 = vector.load %arg2[%c0_1, %c0_2] : memref<32x64xf32, #tpu.memory_space<vmem>>, vector<32x64xf32>
    %cst = arith.constant dense<0.000000e+00> : vector<8x64xf32>
    %2 = tpu.matmul %0, %1, %cst {dimension_numbers = #tpu.dot_dimension_numbers<[1], [0], [0], [1], [0, 0, 1, 1], [], []>} : vector<8x32xf32>, vector<32x64xf32>, vector<8x64xf32> -> vector<8x64xf32>
    %c0_3 = arith.constant 0 : index
    %c0_4 = arith.constant 0 : index
    %3 = vector.load %arg3[%c0_3, %c0_4] : memref<1x64xf32, #tpu.memory_space<vmem>>, vector<1x64xf32>
    %4 = vector.broadcast %3 : vector<1x64xf32> to vector<8x64xf32>
    %5 = arith.addf %2, %4 : vector<8x64xf32>
    %cst_5 = arith.constant 0.000000e+00 : f32
    %6 = vector.broadcast %cst_5 : f32 to vector<8x64xf32>
    %7 = arith.maximumf %5, %6 : vector<8x64xf32>
    %c0_6 = arith.constant 0 : index
    %c0_7 = arith.constant 0 : index
    %8 = vector.load %arg4[%c0_6, %c0_7] : memref<64x32xf32, #tpu.memory_space<vmem>>, vector<64x32xf32>
    %cst_8 = arith.constant dense<0.000000e+00> : vector<8x32xf32>
    %9 = tpu.matmul %7, %8, %cst_8 {dimension_numbers = #tpu.dot_dimension_numbers<[1], [0], [0], [1], [0, 0, 1, 1], [], []>} : vector<8x64xf32>, vector<64x32xf32>, vector<8x32xf32> -> vector<8x32xf32>
    %c0_9 = arith.constant 0 : index
    %c0_10 = arith.constant 0 : index
    %10 = vector.load %arg5[%c0_9, %c0_10] : memref<1x32xf32, #tpu.memory_space<vmem>>, vector<1x32xf32>
    %11 = vector.broadcast %10 : vector<1x32xf32> to vector<8x32xf32>
    %12 = arith.addf %9, %11 : vector<8x32xf32>
    %cst_11 = arith.constant 0.000000e+00 : f32
    %13 = vector.broadcast %cst_11 : f32 to vector<8x32xf32>
    %14 = arith.maximumf %12, %13 : vector<8x32xf32>
    %c0_12 = arith.constant 0 : index
    %c0_13 = arith.constant 0 : index
    %15 = vector.load %arg6[%c0_12, %c0_13] : memref<32x16xf32, #tpu.memory_space<vmem>>, vector<32x16xf32>
    %cst_14 = arith.constant dense<0.000000e+00> : vector<8x16xf32>
    %16 = tpu.matmul %14, %15, %cst_14 {dimension_numbers = #tpu.dot_dimension_numbers<[1], [0], [0], [1], [0, 0, 1, 1], [], []>} : vector<8x32xf32>, vector<32x16xf32>, vector<8x16xf32> -> vector<8x16xf32>
    %c0_15 = arith.constant 0 : index
    %c0_16 = arith.constant 0 : index
    %17 = vector.load %arg7[%c0_15, %c0_16] : memref<1x16xf32, #tpu.memory_space<vmem>>, vector<1x16xf32>
    %18 = vector.broadcast %17 : vector<1x16xf32> to vector<8x16xf32>
    %19 = arith.addf %16, %18 : vector<8x16xf32>
    %cst_17 = arith.constant 0.000000e+00 : f32
    %20 = vector.broadcast %cst_17 : f32 to vector<8x16xf32>
    %21 = arith.maximumf %19, %20 : vector<8x16xf32>
    %c0_18 = arith.constant 0 : index
    %c0_19 = arith.constant 0 : index
    %22 = vector.load %arg8[%c0_18, %c0_19] : memref<8x16xf32, #tpu.memory_space<vmem>>, vector<8x16xf32>
    tpu.vector_store %arg8[%c0_18, %c0_19], %21 {strides = array<i32>} : memref<8x16xf32, #tpu.memory_space<vmem>>, vector<8x16xf32>,
    return
  }
  func.func @transform_0(%arg0: i32) -> (i32, i32) {
    %c0_i32 = arith.constant 0 : i32
    %c0_i32_0 = arith.constant 0 : i32
    return %arg0, %c0_i32 : i32, i32
  }
  func.func @transform_1(%arg0: i32) -> (i32, i32) {
    %c0_i32 = arith.constant 0 : i32
    %c0_i32_0 = arith.constant 0 : i32
    %c0_i32_1 = arith.constant 0 : i32
    return %c0_i32, %c0_i32_0 : i32, i32
  }
  func.func @transform_2(%arg0: i32) -> (i32, i32) {
    %c0_i32 = arith.constant 0 : i32
    %c0_i32_0 = arith.constant 0 : i32
    %c0_i32_1 = arith.constant 0 : i32
    return %c0_i32, %c0_i32_0 : i32, i32
  }
  func.func @transform_3(%arg0: i32) -> (i32, i32) {
    %c0_i32 = arith.constant 0 : i32
    %c0_i32_0 = arith.constant 0 : i32
    %c0_i32_1 = arith.constant 0 : i32
    return %c0_i32, %c0_i32_0 : i32, i32
  }
  func.func @transform_4(%arg0: i32) -> (i32, i32) {
    %c0_i32 = arith.constant 0 : i32
    %c0_i32_0 = arith.constant 0 : i32
    %c0_i32_1 = arith.constant 0 : i32
    return %c0_i32, %c0_i32_0 : i32, i32
  }
  func.func @transform_5(%arg0: i32) -> (i32, i32) {
    %c0_i32 = arith.constant 0 : i32
    %c0_i32_0 = arith.constant 0 : i32
    %c0_i32_1 = arith.constant 0 : i32
    return %c0_i32, %c0_i32_0 : i32, i32
  }
  func.func @transform_6(%arg0: i32) -> (i32, i32) {
    %c0_i32 = arith.constant 0 : i32
    %c0_i32_0 = arith.constant 0 : i32
    %c0_i32_1 = arith.constant 0 : i32
    return %c0_i32, %c0_i32_0 : i32, i32
  }
  func.func @transform_7(%arg0: i32) -> (i32, i32) {
    %c0_i32 = arith.constant 0 : i32
    %c0_i32_0 = arith.constant 0 : i32
    return %arg0, %c0_i32 : i32, i32
  }
}

module attributes {stable_mosaic.version = 11 : i64} {
  func.func @_mlp_kernel(%arg0: i32, %arg1: memref<8x32xf32, #tpu.memory_space<vmem>>, %arg2: memref<32x64xf32, #tpu.memory_space<vmem>>, %arg3: memref<1x64xf32, #tpu.memory_space<vmem>>, %arg4: memref<64x32xf32, #tpu.memory_space<vmem>>, %arg5: memref<1x32xf32, #tpu.memory_space<vmem>>, %arg6: memref<32x16xf32, #tpu.memory_space<vmem>>, %arg7: memref<1x16xf32, #tpu.memory_space<vmem>>, %arg8: memref<8x16xf32, #tpu.memory_space<vmem>>) attributes {dimension_semantics = [#tpu.dimension_semantics<parallel>], iteration_bounds = array<i64: 1>, scalar_prefetch = 0 : i64, scratch_operands = 0 : i64, tpu.core_type = #tpu.core_type<tc>, window_params = [{transform_indices = @transform_0, window_bounds = array<i64: 8, 32>}, {pipeline_mode = #tpu.pipeline_mode<synchronous>, transform_indices = @transform_1, window_bounds = array<i64: 32, 64>}, {pipeline_mode = #tpu.pipeline_mode<synchronous>, transform_indices = @transform_2, window_bounds = array<i64: 1, 64>}, {pipeline_mode = #tpu.pipeline_mode<synchronous>, transform_indices = @transform_3, window_bounds = array<i64: 64, 32>}, {pipeline_mode = #tpu.pipeline_mode<synchronous>, transform_indices = @transform_4, window_bounds = array<i64: 1, 32>}, {pipeline_mode = #tpu.pipeline_mode<synchronous>, transform_indices = @transform_5, window_bounds = array<i64: 32, 16>}, {pipeline_mode = #tpu.pipeline_mode<synchronous>, transform_indices = @transform_6, window_bounds = array<i64: 1, 16>}, {transform_indices = @transform_7, window_bounds = array<i64: 8, 16>}]} {
    %c0 = arith.constant 0 : index
    %c0_0 = arith.constant 0 : index
    %0 = vector.load %arg1[%c0, %c0_0] : memref<8x32xf32, #tpu.memory_space<vmem>>, vector<8x32xf32>
    %c0_1 = arith.constant 0 : index
    %c0_2 = arith.constant 0 : index
    %1 = vector.load %arg2[%c0_1, %c0_2] : memref<32x64xf32, #tpu.memory_space<vmem>>, vector<32x64xf32>
    %cst = arith.constant dense<0.000000e+00> : vector<8x64xf32>
    %2 = tpu.matmul %0, %1, %cst {dimension_numbers = #tpu.dot_dimension_numbers<[1], [0], [0], [1], [0, 0, 1, 1], [], []>} : vector<8x32xf32>, vector<32x64xf32>, vector<8x64xf32> -> vector<8x64xf32>
    %c0_3 = arith.constant 0 : index
    %c0_4 = arith.constant 0 : index
    %3 = vector.load %arg3[%c0_3, %c0_4] : memref<1x64xf32, #tpu.memory_space<vmem>>, vector<1x64xf32>
    %4 = vector.broadcast %3 : vector<1x64xf32> to vector<8x64xf32>
    %5 = arith.addf %2, %4 : vector<8x64xf32>
    %cst_5 = arith.constant 0.000000e+00 : f32
    %6 = vector.broadcast %cst_5 : f32 to vector<8x64xf32>
    %7 = arith.maximumf %5, %6 : vector<8x64xf32>
    %c0_6 = arith.constant 0 : index
    %c0_7 = arith.constant 0 : index
    %8 = vector.load %arg4[%c0_6, %c0_7] : memref<64x32xf32, #tpu.memory_space<vmem>>, vector<64x32xf32>
    %cst_8 = arith.constant dense<0.000000e+00> : vector<8x32xf32>
    %9 = tpu.matmul %7, %8, %cst_8 {dimension_numbers = #tpu.dot_dimension_numbers<[1], [0], [0], [1], [0, 0, 1, 1], [], []>} : vector<8x64xf32>, vector<64x32xf32>, vector<8x32xf32> -> vector<8x32xf32>
    %c0_9 = arith.constant 0 : index
    %c0_10 = arith.constant 0 : index
    %10 = vector.load %arg5[%c0_9, %c0_10] : memref<1x32xf32, #tpu.memory_space<vmem>>, vector<1x32xf32>
    %11 = vector.broadcast %10 : vector<1x32xf32> to vector<8x32xf32>
    %12 = arith.addf %9, %11 : vector<8x32xf32>
    %cst_11 = arith.constant 0.000000e+00 : f32
    %13 = vector.broadcast %cst_11 : f32 to vector<8x32xf32>
    %14 = arith.maximumf %12, %13 : vector<8x32xf32>
    %c0_12 = arith.constant 0 : index
    %c0_13 = arith.constant 0 : index
    %15 = vector.load %arg6[%c0_12, %c0_13] : memref<32x16xf32, #tpu.memory_space<vmem>>, vector<32x16xf32>
    %cst_14 = arith.constant dense<0.000000e+00> : vector<8x16xf32>
    %16 = tpu.matmul %14, %15, %cst_14 {dimension_numbers = #tpu.dot_dimension_numbers<[1], [0], [0], [1], [0, 0, 1, 1], [], []>} : vector<8x32xf32>, vector<32x16xf32>, vector<8x16xf32> -> vector<8x16xf32>
    %c0_15 = arith.constant 0 : index
    %c0_16 = arith.constant 0 : index
    %17 = vector.load %arg7[%c0_15, %c0_16] : memref<1x16xf32, #tpu.memory_space<vmem>>, vector<1x16xf32>
    %18 = vector.broadcast %17 : vector<1x16xf32> to vector<8x16xf32>
    %19 = arith.addf %16, %18 : vector<8x16xf32>
    %cst_17 = arith.constant 0.000000e+00 : f32
    %20 = vector.broadcast %cst_17 : f32 to vector<8x16xf32>
    %21 = arith.maximumf %19, %20 : vector<8x16xf32>
    %c0_18 = arith.constant 0 : index
    %c0_19 = arith.constant 0 : index
    %22 = vector.load %arg8[%c0_18, %c0_19] : memref<8x16xf32, #tpu.memory_space<vmem>>, vector<8x16xf32>
    tpu.vector_store %arg8[%c0_18, %c0_19], %21 {strides = array<i32>} : memref<8x16xf32, #tpu.memory_space<vmem>>, vector<8x16xf32>,
    return
  }
  func.func @transform_0(%arg0: i32) -> (i32, i32) {
    %c0_i32 = arith.constant 0 : i32
    %c0_i32_0 = arith.constant 0 : i32
    return %arg0, %c0_i32 : i32, i32
  }
  func.func @transform_1(%arg0: i32) -> (i32, i32) {
    %c0_i32 = arith.constant 0 : i32
    %c0_i32_0 = arith.constant 0 : i32
    %c0_i32_1 = arith.constant 0 : i32
    return %c0_i32, %c0_i32_0 : i32, i32
  }
  func.func @transform_2(%arg0: i32) -> (i32, i32) {
    %c0_i32 = arith.constant 0 : i32
    %c0_i32_0 = arith.constant 0 : i32
    %c0_i32_1 = arith.constant 0 : i32
    return %c0_i32, %c0_i32_0 : i32, i32
  }
  func.func @transform_3(%arg0: i32) -> (i32, i32) {
    %c0_i32 = arith.constant 0 : i32
    %c0_i32_0 = arith.constant 0 : i32
    %c0_i32_1 = arith.constant 0 : i32
    return %c0_i32, %c0_i32_0 : i32, i32
  }
  func.func @transform_4(%arg0: i32) -> (i32, i32) {
    %c0_i32 = arith.constant 0 : i32
    %c0_i32_0 = arith.constant 0 : i32
    %c0_i32_1 = arith.constant 0 : i32
    return %c0_i32, %c0_i32_0 : i32, i32
  }
  func.func @transform_5(%arg0: i32) -> (i32, i32) {
    %c0_i32 = arith.constant 0 : i32
    %c0_i32_0 = arith.constant 0 : i32
    %c0_i32_1 = arith.constant 0 : i32
    return %c0_i32, %c0_i32_0 : i32, i32
  }
  func.func @transform_6(%arg0: i32) -> (i32, i32) {
    %c0_i32 = arith.constant 0 : i32
    %c0_i32_0 = arith.constant 0 : i32
    %c0_i32_1 = arith.constant 0 : i32
    return %c0_i32, %c0_i32_0 : i32, i32
  }
  func.func @transform_7(%arg0: i32) -> (i32, i32) {
    %c0_i32 = arith.constant 0 : i32
    %c0_i32_0 = arith.constant 0 : i32
    return %arg0, %c0_i32 : i32, i32
  }
}

</mosaic_0001>

<bundles_post_ra>
// kernel: _forward.1
= control target key start
LH: loop header
LB: loop body
LE: loop exit
PB: predicated region body
PF: predicated region fallthrough
CT: control target
= control target key end

     0   :  { %v396_v1 = vmov 0.0   ;;  %vm397_vm0 = vmmov 0   ;;  %s507_s0 = inlined_call_operand.vmem [shape: f32[8,32], index: 0, kind: input, shape index: {}]   ;;  %s508_s1 = inlined_call_operand.vmem [shape: f32[32,64], index: 1, kind: input, shape index: {}]   ;;  %s509_s2 = inlined_call_operand.vmem [shape: f32[1,64], index: 2, kind: input, shape index: {}]   ;;  %s510_s3 = inlined_call_operand.vmem [shape: f32[64,32], index: 3, kind: input, shape index: {}]   ;;  %s511_s4 = inlined_call_operand.vmem [shape: f32[1,32], index: 4, kind: input, shape index: {}]   ;;  %s512_s5 = inlined_call_operand.vmem [shape: f32[32,16], index: 5, kind: input, shape index: {}]   ;;  %s513_s6 = inlined_call_operand.vmem [shape: f32[1,16], index: 6, kind: input, shape index: {}]   ;;  %s514_s7 = inlined_call_operand.hbm [shape: f32[8,16], index: 7, kind: output, shape index: {}]  }
   0x1   :  { %v31_v0 = vld [vmem:[%s508_s1 + $0x18] sm:$0xff]  ;;  %330 = vmatprep.subr.mxu0 %v396_v1  ;;  %v30_v2 = vld [vmem:[%s508_s1 + $0x10] sm:$0xff]  ;;  %338 = vmatprep.mubr.msk.f32.mxu0 %vm397_vm0, %v396_v1  ;;  %v29_v5 = vld [vmem:[%s508_s1 + $0x8] sm:$0xff] }
   0x2   :  { %v121_v3 = vld [vmem:[%s510_s3 + $0x38] sm:$0xff]  ;;  %331 = vmatpush3.msra.mxu0 %v31_v0  ;;  %341 = vmatprep.subr.mxu1 %v396_v1  ;;  %v120_v4 = vld [vmem:[%s510_s3 + $0x30] sm:$0xff] }
   0x3   :  { %332 = vmatprep.subr.mxu0 %v396_v1  ;;  %342 = vmatpush3.msra.mxu1 %v121_v3 }
   0x4   :  { %12 = vsyncpa [#allocation3], 0  ;;  %333 = vmatpush3.msra.mxu0 %v30_v2  ;;  %343 = vmatprep.subr.mxu1 %v396_v1  ;;  %v119_v6 = vld [vmem:[%s510_s3 + $0x28] sm:$0xff]  ;;  %v28_v7 = vld [vmem:[%s508_s1] sm:$0xff]  ;;  %vm39_vm1 = vcmask 261120   ;;  %vm129_vm2 = vcmask 523264  }
   0x5   :  { %334 = vmatprep.subr.mxu0 %v396_v1  ;;  %344 = vmatpush3.msra.mxu1 %v120_v4  ;;  %v27_v8 = vld [vmem:[%s507_s0] sm:$0xff]  ;;  %v117_v10 = vld [vmem:[%s510_s3 + $0x18] sm:$0xff]  ;;  %v116_v11 = vld [vmem:[%s510_s3 + $0x10] sm:$0xff]  ;;  %s398_s14 = smov [#allocation2]   ;;  %vm289_vm3 = vcmask 130048  }
   0x6   :  { %335 = vmatpush3.msra.mxu0 %v29_v5  ;;  %345 = vmatprep.subr.mxu1 %v396_v1  ;;  %v118_v9 = vld [vmem:[%s510_s3 + $0x20] sm:$0xff]  ;;  %v115_v12 = vld [vmem:[%s510_s3 + $0x8] sm:$0xff]  ;;  %v207_v14 = vld [vmem:[%s512_s5 + $0x18] sm:$0xff]  ;;  %s297_s15 = sshll.u32 %s398_s14, 4  ;;  %s298_s15 = int_to_ptr.vmem [resolvable:$true] %s297_s15 }
   0x7   :  { %336 = vmatprep.subr.mxu0 %v396_v1  ;;  %346 = vmatpush3.msra.mxu1 %v119_v6  ;;  %v114_v13 = vld [vmem:[%s510_s3] sm:$0xff]  ;;  %v206_v20 = vld [vmem:[%s512_s5 + $0x10] sm:$0xff]  ;;  %v205_v21 = vld [vmem:[%s512_s5 + $0x8] sm:$0xff]  ;;  %p379_p1 = scmp.lt.s32.totalorder %s298_s15, %s298_s15 }
   0x8   :  { %337 = vmatpush3.msra.mxu0 %v28_v7  ;;  %347 = vmatprep.subr.mxu1 %v396_v1  ;;  %v305_v15 = vld [vmem:[%s509_s2] ss:$0 sm:$0xff] }
   0x9   :  { %339 = vmatmul.mubr.msk.f32.vlgmr.msra.gmra.mxu0 %vm39_vm1, %v27_v8  ;;  %348 = vmatpush3.msra.mxu1 %v118_v9  ;;  %v204_v22 = vld [vmem:[%s512_s5] sm:$0xff] }
   0xa   :  { %349 = vmatprep.subr.mxu1 %v396_v1  ;;  %357 = vmatprep.mubr.msk.f32.mxu1 %vm397_vm0, %v396_v1  ;;  %v307_v23 = vld [vmem:[%s511_s4] ss:$0 sm:$0xff]  ;;  %s374_s4 = scalar_lea.vmem %s298_s15, 128 }
   0xb   :  { %350 = vmatpush3.msra.mxu1 %v117_v10  ;;  %360 = vmatprep.subr.mxu0 %v396_v1  ;;  %v309_v28 = vld [vmem:[%s513_s6] ss:$0 sm:$0xff]  ;;  %p375_p0 = scmp.ne.s32.totalorder %s298_s15, %s374_s4  ;;  %p380_p2 = scmp.lt.s32.totalorder %s374_s4, %s374_s4 }
   0xc   :  { %351 = vmatprep.subr.mxu1 %v396_v1  ;;  %368 = vmatprep.mubr.msk.f32.mxu0 %vm397_vm0, %v396_v1 }
   0xd   :  { %352 = vmatpush3.msra.mxu1 %v116_v11  ;;  %361 = vmatpush3.msra.mxu0 %v207_v14  ;;  %p381_p3 = por %p380_p2, %p379_p1 }
   0xe   :  { %353 = vmatprep.subr.mxu1 %v396_v1  ;;  %362 = vmatprep.subr.mxu0 %v396_v1 }
   0xf   :  { %354 = vmatpush3.msra.mxu1 %v115_v12  ;;  %363 = vmatpush3.msra.mxu0 %v206_v20  ;;  %p382_p4 = pnand %p381_p3, %p375_p0 }
  0x10   :  { %355 = vmatprep.subr.mxu1 %v396_v1  ;;  %364 = vmatprep.subr.mxu0 %v396_v1 }
  0x11   :  { %356 = vmatpush3.msra.mxu1 %v114_v13  ;;  %365 = vmatpush3.msra.mxu0 %v205_v21 }
  0x12   :  { %366 = vmatprep.subr.mxu0 %v396_v1 }
  0x13   :  { %367 = vmatpush3.msra.mxu0 %v204_v22 }
  0xc9   :  { %v109_v16 = vpop.f32.mrf.mxu0 }
  0xca   :  { %v110_v17 = vadd.f32 %v305_v15, %v109_v16 }
  0xcb   :  { %v340_v18 = vpop.f32.mrf.mxu0 }
  0xcc   :  { %v113_v19 = vmax.f32 %v110_v17, 0.0 }
  0xce   :  { %358 = vmatmul.mubr.msk.f32.vlgmr.msra.gmra.mxu1 %vm129_vm2, %v113_v19 }
 0x18e   :  { %v199_v24 = vpop.f32.mrf.mxu1 }
 0x18f   :  { %v200_v25 = vadd.f32 %v307_v23, %v199_v24 }
 0x190   :  { %v359_v26 = vpop.f32.mrf.mxu1 }
 0x191   :  { %v203_v27 = vmax.f32 %v200_v25, 0.0 }
 0x193   :  { %369 = vmatmul.mubr.msk.f32.vlgmr.msra.gmra.mxu0 %vm39_vm1, %v203_v27 }
 0x253   :  { %v284_v29 = vpop.f32.mrf.mxu0 }
 0x254   :  { %v285_v30 = vadd.f32 %v309_v28, %v284_v29 }
 0x255   :  { %v370_v31 = vpop.f32.mrf.mxu0 }
 0x256   :  { %v288_v32 = vmax.f32 %v285_v30, 0.0 }
 0x258   :  { %290 = vst.msk [vmem:[#allocation2] sm:$0xff] %vm289_vm3, %v288_v32 }
 0x259   :  { %385 = shalt.err (!%p382_p4)
}
 0x25a   :  { %300 = dma.vmem_to_hbm [thread:$0]  %s298_s15, 128, %s514_s7, [#allocation3]  }
 0x25b   :  { %394 = dma.done.wait [#allocation3], 128  }
 0x25c   :  { %395 = vsyncadd [#allocation3], 4294967168 }
 0x25d   :  { %304 = vsyncpa [#allocation3], 1 }

// kernel: _forward.1
= control target key start
LH: loop header
LB: loop body
LE: loop exit
PB: predicated region body
PF: predicated region fallthrough
CT: control target
= control target key end

     0   :  { %v396_v1 = vmov 0.0   ;;  %vm397_vm0 = vmmov 0   ;;  %s507_s0 = inlined_call_operand.vmem [shape: f32[8,32], index: 0, kind: input, shape index: {}]   ;;  %s508_s1 = inlined_call_operand.vmem [shape: f32[32,64], index: 1, kind: input, shape index: {}]   ;;  %s509_s2 = inlined_call_operand.vmem [shape: f32[1,64], index: 2, kind: input, shape index: {}]   ;;  %s510_s3 = inlined_call_operand.vmem [shape: f32[64,32], index: 3, kind: input, shape index: {}]   ;;  %s511_s4 = inlined_call_operand.vmem [shape: f32[1,32], index: 4, kind: input, shape index: {}]   ;;  %s512_s5 = inlined_call_operand.vmem [shape: f32[32,16], index: 5, kind: input, shape index: {}]   ;;  %s513_s6 = inlined_call_operand.vmem [shape: f32[1,16], index: 6, kind: input, shape index: {}]   ;;  %s514_s7 = inlined_call_operand.hbm [shape: f32[8,16], index: 7, kind: output, shape index: {}]  }
   0x1   :  { %v31_v0 = vld [vmem:[%s508_s1 + $0x18] sm:$0xff]  ;;  %330 = vmatprep.subr.mxu0 %v396_v1  ;;  %v30_v2 = vld [vmem:[%s508_s1 + $0x10] sm:$0xff]  ;;  %338 = vmatprep.mubr.msk.f32.mxu0 %vm397_vm0, %v396_v1  ;;  %v29_v5 = vld [vmem:[%s508_s1 + $0x8] sm:$0xff] }
   0x2   :  { %v121_v3 = vld [vmem:[%s510_s3 + $0x38] sm:$0xff]  ;;  %331 = vmatpush3.msra.mxu0 %v31_v0  ;;  %341 = vmatprep.subr.mxu1 %v396_v1  ;;  %v120_v4 = vld [vmem:[%s510_s3 + $0x30] sm:$0xff] }
   0x3   :  { %332 = vmatprep.subr.mxu0 %v396_v1  ;;  %342 = vmatpush3.msra.mxu1 %v121_v3 }
   0x4   :  { %12 = vsyncpa [#allocation3], 0  ;;  %333 = vmatpush3.msra.mxu0 %v30_v2  ;;  %343 = vmatprep.subr.mxu1 %v396_v1  ;;  %v119_v6 = vld [vmem:[%s510_s3 + $0x28] sm:$0xff]  ;;  %v28_v7 = vld [vmem:[%s508_s1] sm:$0xff]  ;;  %vm39_vm1 = vcmask 261120   ;;  %vm129_vm2 = vcmask 523264  }
   0x5   :  { %334 = vmatprep.subr.mxu0 %v396_v1  ;;  %344 = vmatpush3.msra.mxu1 %v120_v4  ;;  %v27_v8 = vld [vmem:[%s507_s0] sm:$0xff]  ;;  %v117_v10 = vld [vmem:[%s510_s3 + $0x18] sm:$0xff]  ;;  %v116_v11 = vld [vmem:[%s510_s3 + $0x10] sm:$0xff]  ;;  %s398_s14 = smov [#allocation2]   ;;  %vm289_vm3 = vcmask 130048  }
   0x6   :  { %335 = vmatpush3.msra.mxu0 %v29_v5  ;;  %345 = vmatprep.subr.mxu1 %v396_v1  ;;  %v118_v9 = vld [vmem:[%s510_s3 + $0x20] sm:$0xff]  ;;  %v115_v12 = vld [vmem:[%s510_s3 + $0x8] sm:$0xff]  ;;  %v207_v14 = vld [vmem:[%s512_s5 + $0x18] sm:$0xff]  ;;  %s297_s15 = sshll.u32 %s398_s14, 4  ;;  %s298_s15 = int_to_ptr.vmem [resolvable:$true] %s297_s15 }
   0x7   :  { %336 = vmatprep.subr.mxu0 %v396_v1  ;;  %346 = vmatpush3.msra.mxu1 %v119_v6  ;;  %v114_v13 = vld [vmem:[%s510_s3] sm:$0xff]  ;;  %v206_v20 = vld [vmem:[%s512_s5 + $0x10] sm:$0xff]  ;;  %v205_v21 = vld [vmem:[%s512_s5 + $0x8] sm:$0xff]  ;;  %p379_p1 = scmp.lt.s32.totalorder %s298_s15, %s298_s15 }
   0x8   :  { %337 = vmatpush3.msra.mxu0 %v28_v7  ;;  %347 = vmatprep.subr.mxu1 %v396_v1  ;;  %v305_v15 = vld [vmem:[%s509_s2] ss:$0 sm:$0xff] }
   0x9   :  { %339 = vmatmul.mubr.msk.f32.vlgmr.msra.gmra.mxu0 %vm39_vm1, %v27_v8  ;;  %348 = vmatpush3.msra.mxu1 %v118_v9  ;;  %v204_v22 = vld [vmem:[%s512_s5] sm:$0xff] }
   0xa   :  { %349 = vmatprep.subr.mxu1 %v396_v1  ;;  %357 = vmatprep.mubr.msk.f32.mxu1 %vm397_vm0, %v396_v1  ;;  %v307_v23 = vld [vmem:[%s511_s4] ss:$0 sm:$0xff]  ;;  %s374_s4 = scalar_lea.vmem %s298_s15, 128 }
   0xb   :  { %350 = vmatpush3.msra.mxu1 %v117_v10  ;;  %360 = vmatprep.subr.mxu0 %v396_v1  ;;  %v309_v28 = vld [vmem:[%s513_s6] ss:$0 sm:$0xff]  ;;  %p375_p0 = scmp.ne.s32.totalorder %s298_s15, %s374_s4  ;;  %p380_p2 = scmp.lt.s32.totalorder %s374_s4, %s374_s4 }
   0xc   :  { %351 = vmatprep.subr.mxu1 %v396_v1  ;;  %368 = vmatprep.mubr.msk.f32.mxu0 %vm397_vm0, %v396_v1 }
   0xd   :  { %352 = vmatpush3.msra.mxu1 %v116_v11  ;;  %361 = vmatpush3.msra.mxu0 %v207_v14  ;;  %p381_p3 = por %p380_p2, %p379_p1 }
   0xe   :  { %353 = vmatprep.subr.mxu1 %v396_v1  ;;  %362 = vmatprep.subr.mxu0 %v396_v1 }
   0xf   :  { %354 = vmatpush3.msra.mxu1 %v115_v12  ;;  %363 = vmatpush3.msra.mxu0 %v206_v20  ;;  %p382_p4 = pnand %p381_p3, %p375_p0 }
  0x10   :  { %355 = vmatprep.subr.mxu1 %v396_v1  ;;  %364 = vmatprep.subr.mxu0 %v396_v1 }
  0x11   :  { %356 = vmatpush3.msra.mxu1 %v114_v13  ;;  %365 = vmatpush3.msra.mxu0 %v205_v21 }
  0x12   :  { %366 = vmatprep.subr.mxu0 %v396_v1 }
  0x13   :  { %367 = vmatpush3.msra.mxu0 %v204_v22 }
  0xc9   :  { %v109_v16 = vpop.f32.mrf.mxu0 }
  0xca   :  { %v110_v17 = vadd.f32 %v305_v15, %v109_v16 }
  0xcb   :  { %v340_v18 = vpop.f32.mrf.mxu0 }
  0xcc   :  { %v113_v19 = vmax.f32 %v110_v17, 0.0 }
  0xce   :  { %358 = vmatmul.mubr.msk.f32.vlgmr.msra.gmra.mxu1 %vm129_vm2, %v113_v19 }
 0x18e   :  { %v199_v24 = vpop.f32.mrf.mxu1 }
 0x18f   :  { %v200_v25 = vadd.f32 %v307_v23, %v199_v24 }
 0x190   :  { %v359_v26 = vpop.f32.mrf.mxu1 }
 0x191   :  { %v203_v27 = vmax.f32 %v200_v25, 0.0 }
 0x193   :  { %369 = vmatmul.mubr.msk.f32.vlgmr.msra.gmra.mxu0 %vm39_vm1, %v203_v27 }
 0x253   :  { %v284_v29 = vpop.f32.mrf.mxu0 }
 0x254   :  { %v285_v30 = vadd.f32 %v309_v28, %v284_v29 }
 0x255   :  { %v370_v31 = vpop.f32.mrf.mxu0 }
 0x256   :  { %v288_v32 = vmax.f32 %v285_v30, 0.0 }
 0x258   :  { %290 = vst.msk [vmem:[#allocation2] sm:$0xff] %vm289_vm3, %v288_v32 }
 0x259   :  { %385 = shalt.err (!%p382_p4)
}
 0x25a   :  { %300 = dma.vmem_to_hbm [thread:$0]  %s298_s15, 128, %s514_s7, [#allocation3]  }
 0x25b   :  { %394 = dma.done.wait [#allocation3], 128  }
 0x25c   :  { %395 = vsyncadd [#allocation3], 4294967168 }
 0x25d   :  { %304 = vsyncpa [#allocation3], 1 }

</bundles_post_ra>
